<compile_context>
chip_gen: v7x
topology: tpu7x:2x2x1
jax: 0.10.0
libtpu: 0.0.40
codegen_flags: <defaults>
</compile_context>

<pallas_src>
import functools

import jax
import jax.numpy as jnp
from jax.experimental import pallas as pl
from jax.experimental.pallas import tpu as pltpu


# ------------------------- fused GConvNet forward kernel ---------------------
def gconvnet_kernel(h0_ref, adj_ref,
                    b0_ref, w1_ref, b1_ref, w2_ref, b2_ref, w3_ref, b3_ref,
                    wm1_ref, bm1_ref, bn_scale_ref, bn_shift_ref,
                    wm2_ref, bm2_ref,
                    out_ref, *, alpha, num_graphs):
    # h0_ref:  (N, H) bf16  -- x @ w0^T precomputed in the wrapper (K=4 hoist)
    # adj_ref: (N, N) bf16  -- D^-1/2 (A + I) D^-1/2
    # wK_ref:  (H, H) bf16 pre-transposed GCN weights; bK_ref: (1, H) f32
    # wm1_ref: (4H, H) bf16; wm2_ref: (H, C_pad) bf16 lane-padded; biases f32
    # out_ref: (G, C_pad) f32 lane-dense output slab
    adj = adj_ref[...]                                        # (N, N) bf16
    N = adj.shape[0]
    H = h0_ref.shape[1]
    per = N // num_graphs

    def aggregate(h_bf16, b_ref):
        # neighbourhood aggregation on the MXU (bf16 operands, f32 accumulate)
        agg = jnp.dot(adj, h_bf16, preferred_element_type=jnp.float32) + b_ref[...]
        return jnp.maximum(agg, alpha * agg)                  # LeakyReLU(alpha)

    def gcn(x_f32, w_ref, b_ref):
        h = jnp.dot(x_f32.astype(jnp.bfloat16), w_ref[...],
                    preferred_element_type=jnp.float32)
        return aggregate(h.astype(jnp.bfloat16), b_ref)

    x0 = aggregate(h0_ref[...], b0_ref)                       # init_graph
    x1 = gcn(x0, w1_ref, b1_ref)                              # head
    x2 = gcn(x1, w2_ref, b2_ref)                              # body
    x3 = x0 + x2                                              # residual add
    x4 = gcn(x3, w3_ref, b3_ref)                              # tail

    # global max pool per branch: one reshape-reduce, no mask, no scratch.
    def pool(xi):                                             # (N, H) -> (G, H)
        return jnp.max(xi.reshape(num_graphs, per, H), axis=1)

    # MLP Linear(4H->H) distributed over torch.cat((x4, x1, x2, x3)) partitions,
    # so the 4H concat never materializes (no cross-lane relayout).
    z = bm1_ref[...]                                          # (1, H) f32
    for i, xi in enumerate((x4, x1, x2, x3)):
        p = pool(xi).astype(jnp.bfloat16)                     # (G, H)
        w_blk = wm1_ref[i * H:(i + 1) * H, :]                 # (H, H) bf16
        z = z + jnp.dot(p, w_blk, preferred_element_type=jnp.float32)

    # folded eval BatchNorm1d + ReLU + Linear(H -> C_pad)
    z = z * bn_scale_ref[...] + bn_shift_ref[...]
    z = jnp.maximum(z, 0.0)
    out_ref[...] = (jnp.dot(z.astype(jnp.bfloat16), wm2_ref[...],
                            preferred_element_type=jnp.float32) + bm2_ref[...])


# --------------------------------- wrapper ------------------------------------
def gconvnet_forward(params, x, edge_index, batch_idx, num_graphs, alpha):
    N = x.shape[0]
    H = params["b1"].shape[1]
    C = params["wm2"].shape[0]
    C_pad = -(-C // 128) * 128                                 # lane-dense output

    assert N % num_graphs == 0, "pooling path assumes equal-size graphs"
    per = N // num_graphs
    try:  # validate contiguous equal-size layout when batch_idx is concrete
        batch_ok = bool(jnp.all(
            batch_idx == jnp.repeat(jnp.arange(num_graphs, dtype=batch_idx.dtype), per)))
    except Exception:
        batch_ok = True
    assert batch_ok, "pooling path assumes contiguous equal-size graphs"

    # normalized adjacency: A[i, j] = 1 for edge j -> i, plus self loops.
    adj = jnp.zeros((N, N), jnp.float32)
    adj = adj.at[edge_index[1], edge_index[0]].set(1.0)
    adj = adj.at[jnp.arange(N), jnp.arange(N)].set(1.0)
    dinv = jax.lax.rsqrt(jnp.sum(adj, axis=1))
    adj_norm = (adj * dinv[:, None] * dinv[None, :]).astype(jnp.bfloat16)

    # hoist the degenerate K=Fin projection of layer 0 into plain XLA.
    h0 = jnp.dot(x, params["w0"].T).astype(jnp.bfloat16)       # (N, H)

    # pre-transpose torch (out, in) weights to (in, out) and pre-cast to bf16.
    w1 = params["w1"].T.astype(jnp.bfloat16)
    w2 = params["w2"].T.astype(jnp.bfloat16)
    w3 = params["w3"].T.astype(jnp.bfloat16)
    wm1 = params["wm1"].T.astype(jnp.bfloat16)                 # (4H, H)
    wm2p = (jnp.zeros((H, C_pad), jnp.float32)
            .at[:, :C].set(params["wm2"].T).astype(jnp.bfloat16))
    bm2p = jnp.zeros((1, C_pad), jnp.float32).at[:, :C].set(params["bm2"])

    # fold eval-mode BatchNorm1d into one scale / shift pair.
    bn_scale = params["bn_gamma"] * jax.lax.rsqrt(params["bn_var"] + 1e-5)
    bn_shift = params["bn_beta"] - params["bn_mean"] * bn_scale

    inputs = (h0, adj_norm,
              params["b0"], w1, params["b1"], w2, params["b2"], w3, params["b3"],
              wm1, params["bm1"], bn_scale, bn_shift, wm2p, bm2p)
    in_specs = [pl.BlockSpec(a.shape, lambda i: (0, 0)) for a in inputs]

    out = pl.pallas_call(
        functools.partial(gconvnet_kernel, alpha=alpha, num_graphs=num_graphs),
        out_shape=jax.ShapeDtypeStruct((num_graphs, C_pad), jnp.float32),
        grid=(1,),
        in_specs=in_specs,
        out_specs=pl.BlockSpec((num_graphs, C_pad), lambda i: (0, 0)),
        compiler_params=pltpu.CompilerParams(
            dimension_semantics=("arbitrary",),
            vmem_limit_bytes=32 * 1024 * 1024),
    )(*inputs)
    return out[:, :C]


# --------------------------------- params -------------------------------------
def init_params(key, num_features, hidden, num_classes):
    ks = jax.random.split(key, 12)
    lin = lambda k, o, i: 0.1 * jax.random.normal(k, (o, i), jnp.float32)
    vec = lambda k, n: 0.1 * jax.random.normal(k, (1, n), jnp.float32)
    return {
        # GCN layers (torch layout: (out_features, in_features))
        "w0": lin(ks[0], hidden, num_features), "b0": vec(ks[1], hidden),
        "w1": lin(ks[2], hidden, hidden),       "b1": vec(ks[3], hidden),
        "w2": lin(ks[4], hidden, hidden),       "b2": vec(ks[5], hidden),
        "w3": lin(ks[6], hidden, hidden),       "b3": vec(ks[7], hidden),
        # MLP
        "wm1": lin(ks[8], hidden, 4 * hidden),   "bm1": vec(ks[9], hidden),
        "wm2": lin(ks[10], num_classes, hidden), "bm2": vec(ks[11], num_classes),
        # BatchNorm1d(hidden) eval-mode params / running stats (torch defaults)
        "bn_gamma": jnp.ones((1, hidden), jnp.float32),
        "bn_beta": jnp.zeros((1, hidden), jnp.float32),
        "bn_mean": jnp.zeros((1, hidden), jnp.float32),
        "bn_var": jnp.ones((1, hidden), jnp.float32),
    }


if __name__ == "__main__":
    num_classes = 10
    num_features = 4
    hidden = 32              # 4*hidden = 128 -> lane-dense MLP contraction
    alpha = 0.01
    # p = 0.5                # dropout: identity in eval mode

    key = jax.random.PRNGKey(0)
    key, kx, kp = jax.random.split(key, 3)

    N = 16                   # 2 graphs x 8 nodes (equal-size, contiguous)
    num_graphs = 2
    x = jax.random.normal(kx, (N, num_features), jnp.float32)
    batch_idx = jnp.repeat(jnp.arange(num_graphs), N // num_graphs)

    # deterministic ring edges inside each graph (both directions)
    node = jnp.arange(N)
    per = N // num_graphs
    nxt = (node + 1) % per + (node // per) * per
    edge_index = jnp.concatenate(
        [jnp.stack([node, nxt], axis=0), jnp.stack([nxt, node], axis=0)], axis=1
    ).astype(jnp.int32)      # (2, 32)

    params = init_params(kp, num_features, hidden, num_classes)

    out = gconvnet_forward(params, x, edge_index, batch_idx, num_graphs, alpha)
    out = jax.block_until_ready(out)
    assert out.shape == (num_graphs, num_classes)
    print("KERNEL_OK")
</pallas_src>

<mosaic_0001>
module attributes {stable_mosaic.version = 11 : i64} {
  func.func @gconvnet_kernel(%arg0: i32, %arg1: memref<16x32xbf16, #tpu.memory_space<vmem>>, %arg2: memref<16x16xbf16, #tpu.memory_space<vmem>>, %arg3: memref<1x32xf32, #tpu.memory_space<vmem>>, %arg4: memref<32x32xbf16, #tpu.memory_space<vmem>>, %arg5: memref<1x32xf32, #tpu.memory_space<vmem>>, %arg6: memref<32x32xbf16, #tpu.memory_space<vmem>>, %arg7: memref<1x32xf32, #tpu.memory_space<vmem>>, %arg8: memref<32x32xbf16, #tpu.memory_space<vmem>>, %arg9: memref<1x32xf32, #tpu.memory_space<vmem>>, %arg10: memref<128x32xbf16, #tpu.memory_space<vmem>>, %arg11: memref<1x32xf32, #tpu.memory_space<vmem>>, %arg12: memref<1x32xf32, #tpu.memory_space<vmem>>, %arg13: memref<1x32xf32, #tpu.memory_space<vmem>>, %arg14: memref<32x128xbf16, #tpu.memory_space<vmem>>, %arg15: memref<1x128xf32, #tpu.memory_space<vmem>>, %arg16: memref<2x128xf32, #tpu.memory_space<vmem>>) attributes {dimension_semantics = [#tpu.dimension_semantics<arbitrary>], iteration_bounds = array<i64: 1>, scalar_prefetch = 0 : i64, scratch_operands = 0 : i64, tpu.core_type = #tpu.core_type<tc>, window_params = [{pipeline_mode = #tpu.pipeline_mode<synchronous>, transform_indices = @transform_0, window_bounds = array<i64: 16, 32>}, {pipeline_mode = #tpu.pipeline_mode<synchronous>, transform_indices = @transform_1, window_bounds = array<i64: 16, 16>}, {pipeline_mode = #tpu.pipeline_mode<synchronous>, transform_indices = @transform_2, window_bounds = array<i64: 1, 32>}, {pipeline_mode = #tpu.pipeline_mode<synchronous>, transform_indices = @transform_3, window_bounds = array<i64: 32, 32>}, {pipeline_mode = #tpu.pipeline_mode<synchronous>, transform_indices = @transform_4, window_bounds = array<i64: 1, 32>}, {pipeline_mode = #tpu.pipeline_mode<synchronous>, transform_indices = @transform_5, window_bounds = array<i64: 32, 32>}, {pipeline_mode = #tpu.pipeline_mode<synchronous>, transform_indices = @transform_6, window_bounds = array<i64: 1, 32>}, {pipeline_mode = #tpu.pipeline_mode<synchronous>, transform_indices = @transform_7, window_bounds = array<i64: 32, 32>}, {pipeline_mode = #tpu.pipeline_mode<synchronous>, transform_indices = @transform_8, window_bounds = array<i64: 1, 32>}, {pipeline_mode = #tpu.pipeline_mode<synchronous>, transform_indices = @transform_9, window_bounds = array<i64: 128, 32>}, {pipeline_mode = #tpu.pipeline_mode<synchronous>, transform_indices = @transform_10, window_bounds = array<i64: 1, 32>}, {pipeline_mode = #tpu.pipeline_mode<synchronous>, transform_indices = @transform_11, window_bounds = array<i64: 1, 32>}, {pipeline_mode = #tpu.pipeline_mode<synchronous>, transform_indices = @transform_12, window_bounds = array<i64: 1, 32>}, {pipeline_mode = #tpu.pipeline_mode<synchronous>, transform_indices = @transform_13, window_bounds = array<i64: 32, 128>}, {pipeline_mode = #tpu.pipeline_mode<synchronous>, transform_indices = @transform_14, window_bounds = array<i64: 1, 128>}, {pipeline_mode = #tpu.pipeline_mode<synchronous>, transform_indices = @transform_15, window_bounds = array<i64: 2, 128>}]} {
    %c0 = arith.constant 0 : index
    %c0_0 = arith.constant 0 : index
    %0 = vector.load %arg2[%c0, %c0_0] : memref<16x16xbf16, #tpu.memory_space<vmem>>, vector<16x16xbf16>
    %c0_1 = arith.constant 0 : index
    %c0_2 = arith.constant 0 : index
    %1 = vector.load %arg1[%c0_1, %c0_2] : memref<16x32xbf16, #tpu.memory_space<vmem>>, vector<16x32xbf16>
    %cst = arith.constant dense<0.000000e+00> : vector<16x32xf32>
    %2 = tpu.matmul %0, %1, %cst {dimension_numbers = #tpu.dot_dimension_numbers<[1], [0], [0], [1], [0, 0, 1, 1], [], []>} : vector<16x16xbf16>, vector<16x32xbf16>, vector<16x32xf32> -> vector<16x32xf32>
    %c0_3 = arith.constant 0 : index
    %c0_4 = arith.constant 0 : index
    %3 = vector.load %arg3[%c0_3, %c0_4] : memref<1x32xf32, #tpu.memory_space<vmem>>, vector<1x32xf32>
    %4 = vector.broadcast %3 : vector<1x32xf32> to vector<16x32xf32>
    %5 = arith.addf %2, %4 : vector<16x32xf32>
    %cst_5 = arith.constant 0.00999999977 : f32
    %6 = vector.broadcast %cst_5 : f32 to vector<16x32xf32>
    %7 = arith.mulf %6, %5 : vector<16x32xf32>
    %8 = arith.maximumf %5, %7 : vector<16x32xf32>
    %9 = arith.truncf %8 : vector<16x32xf32> to vector<16x32xbf16>
    %c0_6 = arith.constant 0 : index
    %c0_7 = arith.constant 0 : index
    %10 = vector.load %arg4[%c0_6, %c0_7] : memref<32x32xbf16, #tpu.memory_space<vmem>>, vector<32x32xbf16>
    %cst_8 = arith.constant dense<0.000000e+00> : vector<16x32xf32>
    %11 = tpu.matmul %9, %10, %cst_8 {dimension_numbers = #tpu.dot_dimension_numbers<[1], [0], [0], [1], [0, 0, 1, 1], [], []>} : vector<16x32xbf16>, vector<32x32xbf16>, vector<16x32xf32> -> vector<16x32xf32>
    %12 = arith.truncf %11 : vector<16x32xf32> to vector<16x32xbf16>
    %cst_9 = arith.constant dense<0.000000e+00> : vector<16x32xf32>
    %13 = tpu.matmul %0, %12, %cst_9 {dimension_numbers = #tpu.dot_dimension_numbers<[1], [0], [0], [1], [0, 0, 1, 1], [], []>} : vector<16x16xbf16>, vector<16x32xbf16>, vector<16x32xf32> -> vector<16x32xf32>
    %c0_10 = arith.constant 0 : index
    %c0_11 = arith.constant 0 : index
    %14 = vector.load %arg5[%c0_10, %c0_11] : memref<1x32xf32, #tpu.memory_space<vmem>>, vector<1x32xf32>
    %15 = vector.broadcast %14 : vector<1x32xf32> to vector<16x32xf32>
    %16 = arith.addf %13, %15 : vector<16x32xf32>
    %cst_12 = arith.constant 0.00999999977 : f32
    %17 = vector.broadcast %cst_12 : f32 to vector<16x32xf32>
    %18 = arith.mulf %17, %16 : vector<16x32xf32>
    %19 = arith.maximumf %16, %18 : vector<16x32xf32>
    %20 = arith.truncf %19 : vector<16x32xf32> to vector<16x32xbf16>
    %c0_13 = arith.constant 0 : index
    %c0_14 = arith.constant 0 : index
    %21 = vector.load %arg6[%c0_13, %c0_14] : memref<32x32xbf16, #tpu.memory_space<vmem>>, vector<32x32xbf16>
    %cst_15 = arith.constant dense<0.000000e+00> : vector<16x32xf32>
    %22 = tpu.matmul %20, %21, %cst_15 {dimension_numbers = #tpu.dot_dimension_numbers<[1], [0], [0], [1], [0, 0, 1, 1], [], []>} : vector<16x32xbf16>, vector<32x32xbf16>, vector<16x32xf32> -> vector<16x32xf32>
    %23 = arith.truncf %22 : vector<16x32xf32> to vector<16x32xbf16>
    %cst_16 = arith.constant dense<0.000000e+00> : vector<16x32xf32>
    %24 = tpu.matmul %0, %23, %cst_16 {dimension_numbers = #tpu.dot_dimension_numbers<[1], [0], [0], [1], [0, 0, 1, 1], [], []>} : vector<16x16xbf16>, vector<16x32xbf16>, vector<16x32xf32> -> vector<16x32xf32>
    %c0_17 = arith.constant 0 : index
    %c0_18 = arith.constant 0 : index
    %25 = vector.load %arg7[%c0_17, %c0_18] : memref<1x32xf32, #tpu.memory_space<vmem>>, vector<1x32xf32>
    %26 = vector.broadcast %25 : vector<1x32xf32> to vector<16x32xf32>
    %27 = arith.addf %24, %26 : vector<16x32xf32>
    %cst_19 = arith.constant 0.00999999977 : f32
    %28 = vector.broadcast %cst_19 : f32 to vector<16x32xf32>
    %29 = arith.mulf %28, %27 : vector<16x32xf32>
    %30 = arith.maximumf %27, %29 : vector<16x32xf32>
    %31 = arith.addf %8, %30 : vector<16x32xf32>
    %32 = arith.truncf %31 : vector<16x32xf32> to vector<16x32xbf16>
    %c0_20 = arith.constant 0 : index
    %c0_21 = arith.constant 0 : index
    %33 = vector.load %arg8[%c0_20, %c0_21] : memref<32x32xbf16, #tpu.memory_space<vmem>>, vector<32x32xbf16>
    %cst_22 = arith.constant dense<0.000000e+00> : vector<16x32xf32>
    %34 = tpu.matmul %32, %33, %cst_22 {dimension_numbers = #tpu.dot_dimension_numbers<[1], [0], [0], [1], [0, 0, 1, 1], [], []>} : vector<16x32xbf16>, vector<32x32xbf16>, vector<16x32xf32> -> vector<16x32xf32>
    %35 = arith.truncf %34 : vector<16x32xf32> to vector<16x32xbf16>
    %cst_23 = arith.constant dense<0.000000e+00> : vector<16x32xf32>
    %36 = tpu.matmul %0, %35, %cst_23 {dimension_numbers = #tpu.dot_dimension_numbers<[1], [0], [0], [1], [0, 0, 1, 1], [], []>} : vector<16x16xbf16>, vector<16x32xbf16>, vector<16x32xf32> -> vector<16x32xf32>
    %c0_24 = arith.constant 0 : index
    %c0_25 = arith.constant 0 : index
    %37 = vector.load %arg9[%c0_24, %c0_25] : memref<1x32xf32, #tpu.memory_space<vmem>>, vector<1x32xf32>
    %38 = vector.broadcast %37 : vector<1x32xf32> to vector<16x32xf32>
    %39 = arith.addf %36, %38 : vector<16x32xf32>
    %cst_26 = arith.constant 0.00999999977 : f32
    %40 = vector.broadcast %cst_26 : f32 to vector<16x32xf32>
    %41 = arith.mulf %40, %39 : vector<16x32xf32>
    %42 = arith.maximumf %39, %41 : vector<16x32xf32>
    %c0_27 = arith.constant 0 : index
    %c0_28 = arith.constant 0 : index
    %43 = vector.load %arg11[%c0_27, %c0_28] : memref<1x32xf32, #tpu.memory_space<vmem>>, vector<1x32xf32>
    %44 = vector.shape_cast %42 : vector<16x32xf32> to vector<2x8x32xf32>
    %cst_29 = arith.constant dense<0xFF800000> : vector<2x32xf32>
    %45 = vector.multi_reduction <maximumf>, %44, %cst_29 [1] : vector<2x8x32xf32> to vector<2x32xf32>
    %46 = arith.truncf %45 : vector<2x32xf32> to vector<2x32xbf16>
    %c0_30 = arith.constant 0 : index
    %c0_31 = arith.constant 0 : index
    %47 = vector.load %arg10[%c0_30, %c0_31] : memref<128x32xbf16, #tpu.memory_space<vmem>>, vector<32x32xbf16>
    %cst_32 = arith.constant dense<0.000000e+00> : vector<2x32xf32>
    %48 = tpu.matmul %46, %47, %cst_32 {dimension_numbers = #tpu.dot_dimension_numbers<[1], [0], [0], [1], [0, 0, 1, 1], [], []>} : vector<2x32xbf16>, vector<32x32xbf16>, vector<2x32xf32> -> vector<2x32xf32>
    %49 = vector.broadcast %43 : vector<1x32xf32> to vector<2x32xf32>
    %50 = arith.addf %49, %48 : vector<2x32xf32>
    %51 = vector.shape_cast %19 : vector<16x32xf32> to vector<2x8x32xf32>
    %cst_33 = arith.constant dense<0xFF800000> : vector<2x32xf32>
    %52 = vector.multi_reduction <maximumf>, %51, %cst_33 [1] : vector<2x8x32xf32> to vector<2x32xf32>
    %53 = arith.truncf %52 : vector<2x32xf32> to vector<2x32xbf16>
    %c32 = arith.constant 32 : index
    %c0_34 = arith.constant 0 : index
    %54 = vector.load %arg10[%c32, %c0_34] : memref<128x32xbf16, #tpu.memory_space<vmem>>, vector<32x32xbf16>
    %cst_35 = arith.constant dense<0.000000e+00> : vector<2x32xf32>
    %55 = tpu.matmul %53, %54, %cst_35 {dimension_numbers = #tpu.dot_dimension_numbers<[1], [0], [0], [1], [0, 0, 1, 1], [], []>} : vector<2x32xbf16>, vector<32x32xbf16>, vector<2x32xf32> -> vector<2x32xf32>
    %56 = arith.addf %50, %55 : vector<2x32xf32>
    %57 = vector.shape_cast %30 : vector<16x32xf32> to vector<2x8x32xf32>
    %cst_36 = arith.constant dense<0xFF800000> : vector<2x32xf32>
    %58 = vector.multi_reduction <maximumf>, %57, %cst_36 [1] : vector<2x8x32xf32> to vector<2x32xf32>
    %59 = arith.truncf %58 : vector<2x32xf32> to vector<2x32xbf16>
    %c64 = arith.constant 64 : index
    %c0_37 = arith.constant 0 : index
    %60 = vector.load %arg10[%c64, %c0_37] : memref<128x32xbf16, #tpu.memory_space<vmem>>, vector<32x32xbf16>
    %cst_38 = arith.constant dense<0.000000e+00> : vector<2x32xf32>
    %61 = tpu.matmul %59, %60, %cst_38 {dimension_numbers = #tpu.dot_dimension_numbers<[1], [0], [0], [1], [0, 0, 1, 1], [], []>} : vector<2x32xbf16>, vector<32x32xbf16>, vector<2x32xf32> -> vector<2x32xf32>
    %62 = arith.addf %56, %61 : vector<2x32xf32>
    %63 = vector.shape_cast %31 : vector<16x32xf32> to vector<2x8x32xf32>
    %cst_39 = arith.constant dense<0xFF800000> : vector<2x32xf32>
    %64 = vector.multi_reduction <maximumf>, %63, %cst_39 [1] : vector<2x8x32xf32> to vector<2x32xf32>
    %65 = arith.truncf %64 : vector<2x32xf32> to vector<2x32xbf16>
    %c96 = arith.constant 96 : index
    %c0_40 = arith.constant 0 : index
    %66 = vector.load %arg10[%c96, %c0_40] : memref<128x32xbf16, #tpu.memory_space<vmem>>, vector<32x32xbf16>
    %cst_41 = arith.constant dense<0.000000e+00> : vector<2x32xf32>
    %67 = tpu.matmul %65, %66, %cst_41 {dimension_numbers = #tpu.dot_dimension_numbers<[1], [0], [0], [1], [0, 0, 1, 1], [], []>} : vector<2x32xbf16>, vector<32x32xbf16>, vector<2x32xf32> -> vector<2x32xf32>
    %68 = arith.addf %62, %67 : vector<2x32xf32>
    %c0_42 = arith.constant 0 : index
    %c0_43 = arith.constant 0 : index
    %69 = vector.load %arg12[%c0_42, %c0_43] : memref<1x32xf32, #tpu.memory_space<vmem>>, vector<1x32xf32>
    %70 = vector.broadcast %69 : vector<1x32xf32> to vector<2x32xf32>
    %71 = arith.mulf %68, %70 : vector<2x32xf32>
    %c0_44 = arith.constant 0 : index
    %c0_45 = arith.constant 0 : index
    %72 = vector.load %arg13[%c0_44, %c0_45] : memref<1x32xf32, #tpu.memory_space<vmem>>, vector<1x32xf32>
    %73 = vector.broadcast %72 : vector<1x32xf32> to vector<2x32xf32>
    %74 = arith.addf %71, %73 : vector<2x32xf32>
    %cst_46 = arith.constant 0.000000e+00 : f32
    %75 = vector.broadcast %cst_46 : f32 to vector<2x32xf32>
    %76 = arith.maximumf %74, %75 : vector<2x32xf32>
    %77 = arith.truncf %76 : vector<2x32xf32> to vector<2x32xbf16>
    %c0_47 = arith.constant 0 : index
    %c0_48 = arith.constant 0 : index
    %78 = vector.load %arg14[%c0_47, %c0_48] : memref<32x128xbf16, #tpu.memory_space<vmem>>, vector<32x128xbf16>
    %cst_49 = arith.constant dense<0.000000e+00> : vector<2x128xf32>
    %79 = tpu.matmul %77, %78, %cst_49 {dimension_numbers = #tpu.dot_dimension_numbers<[1], [0], [0], [1], [0, 0, 1, 1], [], []>} : vector<2x32xbf16>, vector<32x128xbf16>, vector<2x128xf32> -> vector<2x128xf32>
    %c0_50 = arith.constant 0 : index
    %c0_51 = arith.constant 0 : index
    %80 = vector.load %arg15[%c0_50, %c0_51] : memref<1x128xf32, #tpu.memory_space<vmem>>, vector<1x128xf32>
    %81 = vector.broadcast %80 : vector<1x128xf32> to vector<2x128xf32>
    %82 = arith.addf %79, %81 : vector<2x128xf32>
    %c0_52 = arith.constant 0 : index
    %c0_53 = arith.constant 0 : index
    %83 = vector.load %arg16[%c0_52, %c0_53] : memref<2x128xf32, #tpu.memory_space<vmem>>, vector<2x128xf32>
    tpu.vector_store %arg16[%c0_52, %c0_53], %82 {strides = array<i32>} : memref<2x128xf32, #tpu.memory_space<vmem>>, vector<2x128xf32>,
    return
  }
  func.func @transform_0(%arg0: i32) -> (i32, i32) {
    %c0_i32 = arith.constant 0 : i32
    %c0_i32_0 = arith.constant 0 : i32
    %c0_i32_1 = arith.constant 0 : i32
    return %c0_i32, %c0_i32_0 : i32, i32
  }
  func.func @transform_1(%arg0: i32) -> (i32, i32) {
    %c0_i32 = arith.constant 0 : i32
    %c0_i32_0 = arith.constant 0 : i32
    %c0_i32_1 = arith.constant 0 : i32
    return %c0_i32, %c0_i32_0 : i32, i32
  }
  func.func @transform_2(%arg0: i32) -> (i32, i32) {
    %c0_i32 = arith.constant 0 : i32
    %c0_i32_0 = arith.constant 0 : i32
    %c0_i32_1 = arith.constant 0 : i32
    return %c0_i32, %c0_i32_0 : i32, i32
  }
  func.func @transform_3(%arg0: i32) -> (i32, i32) {
    %c0_i32 = arith.constant 0 : i32
    %c0_i32_0 = arith.constant 0 : i32
    %c0_i32_1 = arith.constant 0 : i32
    return %c0_i32, %c0_i32_0 : i32, i32
  }
  func.func @transform_4(%arg0: i32) -> (i32, i32) {
    %c0_i32 = arith.constant 0 : i32
    %c0_i32_0 = arith.constant 0 : i32
    %c0_i32_1 = arith.constant 0 : i32
    return %c0_i32, %c0_i32_0 : i32, i32
  }
  func.func @transform_5(%arg0: i32) -> (i32, i32) {
    %c0_i32 = arith.constant 0 : i32
    %c0_i32_0 = arith.constant 0 : i32
    %c0_i32_1 = arith.constant 0 : i32
    return %c0_i32, %c0_i32_0 : i32, i32
  }
  func.func @transform_6(%arg0: i32) -> (i32, i32) {
    %c0_i32 = arith.constant 0 : i32
    %c0_i32_0 = arith.constant 0 : i32
    %c0_i32_1 = arith.constant 0 : i32
    return %c0_i32, %c0_i32_0 : i32, i32
  }
  func.func @transform_7(%arg0: i32) -> (i32, i32) {
    %c0_i32 = arith.constant 0 : i32
    %c0_i32_0 = arith.constant 0 : i32
    %c0_i32_1 = arith.constant 0 : i32
    return %c0_i32, %c0_i32_0 : i32, i32
  }
  func.func @transform_8(%arg0: i32) -> (i32, i32) {
    %c0_i32 = arith.constant 0 : i32
    %c0_i32_0 = arith.constant 0 : i32
    %c0_i32_1 = arith.constant 0 : i32
    return %c0_i32, %c0_i32_0 : i32, i32
  }
  func.func @transform_9(%arg0: i32) -> (i32, i32) {
    %c0_i32 = arith.constant 0 : i32
    %c0_i32_0 = arith.constant 0 : i32
    %c0_i32_1 = arith.constant 0 : i32
    return %c0_i32, %c0_i32_0 : i32, i32
  }
  func.func @transform_10(%arg0: i32) -> (i32, i32) {
    %c0_i32 = arith.constant 0 : i32
    %c0_i32_0 = arith.constant 0 : i32
    %c0_i32_1 = arith.constant 0 : i32
    return %c0_i32, %c0_i32_0 : i32, i32
  }
  func.func @transform_11(%arg0: i32) -> (i32, i32) {
    %c0_i32 = arith.constant 0 : i32
    %c0_i32_0 = arith.constant 0 : i32
    %c0_i32_1 = arith.constant 0 : i32
    return %c0_i32, %c0_i32_0 : i32, i32
  }
  func.func @transform_12(%arg0: i32) -> (i32, i32) {
    %c0_i32 = arith.constant 0 : i32
    %c0_i32_0 = arith.constant 0 : i32
    %c0_i32_1 = arith.constant 0 : i32
    return %c0_i32, %c0_i32_0 : i32, i32
  }
  func.func @transform_13(%arg0: i32) -> (i32, i32) {
    %c0_i32 = arith.constant 0 : i32
    %c0_i32_0 = arith.constant 0 : i32
    %c0_i32_1 = arith.constant 0 : i32
    return %c0_i32, %c0_i32_0 : i32, i32
  }
  func.func @transform_14(%arg0: i32) -> (i32, i32) {
    %c0_i32 = arith.constant 0 : i32
    %c0_i32_0 = arith.constant 0 : i32
    %c0_i32_1 = arith.constant 0 : i32
    return %c0_i32, %c0_i32_0 : i32, i32
  }
  func.func @transform_15(%arg0: i32) -> (i32, i32) {
    %c0_i32 = arith.constant 0 : i32
    %c0_i32_0 = arith.constant 0 : i32
    %c0_i32_1 = arith.constant 0 : i32
    return %c0_i32, %c0_i32_0 : i32, i32
  }
}

</mosaic_0001>

<bundles_post_ra>
// kernel: tpu_custom_call.1
= control target key start
LH: loop header
LB: loop body
LE: loop exit
PB: predicated region body
PF: predicated region fallthrough
CT: control target
= control target key end

     0   :  { %v1119_v1 = vmov 0.0   ;;  %vm1120_vm0 = vmmov 0   ;;  %vm74_vm1 = vcmask 130048   ;;  %s1386_s0 = inlined_call_operand.vmem [shape: bf16[16,32], index: 0, kind: input, shape index: {}]   ;;  %s1387_s1 = inlined_call_operand.vmem [shape: bf16[16,16], index: 1, kind: input, shape index: {}]   ;;  %s1388_s2 = inlined_call_operand.vmem [shape: f32[1,32], index: 2, kind: input, shape index: {}]   ;;  %s1389_s3 = inlined_call_operand.vmem [shape: bf16[32,32], index: 3, kind: input, shape index: {}]   ;;  %s1390_s4 = inlined_call_operand.vmem [shape: f32[1,32], index: 4, kind: input, shape index: {}]   ;;  %s1391_s5 = inlined_call_operand.vmem [shape: bf16[32,32], index: 5, kind: input, shape index: {}]   ;;  %s1392_s6 = inlined_call_operand.vmem [shape: f32[1,32], index: 6, kind: input, shape index: {}]   ;;  %s1393_s7 = inlined_call_operand.vmem [shape: bf16[32,32], index: 7, kind: input, shape index: {}]   ;;  %s1394_s8 = inlined_call_operand.vmem [shape: f32[1,32], index: 8, kind: input, shape index: {}]   ;;  %s1395_s9 = inlined_call_operand.vmem [shape: bf16[128,32], index: 9, kind: input, shape index: {}]   ;;  %s1396_s10 = inlined_call_operand.vmem [shape: f32[1,32], index: 10, kind: input, shape index: {}]   ;;  %s1397_s11 = inlined_call_operand.vmem [shape: f32[1,32], index: 11, kind: input, shape index: {}]   ;;  %s1398_s12 = inlined_call_operand.vmem [shape: f32[1,32], index: 12, kind: input, shape index: {}]   ;;  %s1399_s13 = inlined_call_operand.vmem [shape: bf16[32,128], index: 13, kind: input, shape index: {}]   ;;  %s1400_s14 = inlined_call_operand.vmem [shape: f32[1,128], index: 14, kind: input, shape index: {}]   ;;  %s1401_s15 = inlined_call_operand.hbm [shape: f32[2,128], index: 15, kind: output, shape index: {}]  }
   0x1   :  { %v1077_v0 = vld [vmem:[%s1386_s0] sm:$0xff]   ;;  %973 = vmatprep.subr.bf16.mxu0 %v1119_v1  ;;  %993 = vmatprep.subr.bf16.mxu1 %v1119_v1 }
   0x2   :  { %v1209_v2 = vld [vmem:[%s1387_s1] sm:$0xff]   ;;  %974 = vmatpush3.bf16.msra.mxu0 %v1077_v0  ;;  %975 = vmatprep.mubr.msk.bf16.mxu0 %vm1120_vm0, %v1119_v1 }
   0x3   :  { %979 = vmatprep.subr.bf16.mxu0 %v1119_v1  ;;  %997 = vmatprep.mubr.msk.bf16.mxu1 %vm1120_vm0, %v1119_v1 }
   0x5   :  { %976 = vmatmul.mubr.msk.bf16.vlgmr.msra.gmra.mrb[0].mxu0 %vm74_vm1, %v1209_v2 }
   0x6   :  { %983 = vmatprep.mubr.msk.bf16.mxu0 %vm1120_vm0, %v1119_v1 }
   0x7   :  { %20 = vsyncpa [#allocation3], 0  ;;  %v1079_v3 = vld [vmem:[%s1389_s3] sm:$0xff]   ;;  %v1080_v4 = vld [vmem:[%s1389_s3 + $0x8] sm:$0xff]   ;;  %vm140_vm2 = vcmask 261120   ;;  %vm493_vm3 = vcmask 1041409  }
   0x8   :  { %980 = vmatpush3.bf16.msra.mxu0 %v1079_v3  ;;  %v903_v5 = vld [vmem:[%s1388_s2] ss:$0 sm:$0xff]  ;;  %v1082_v23 = vld [vmem:[%s1391_s5 + $0x8] sm:$0xff]   ;;  %s1121_s20 = smov [#allocation2]  }
   0x9   :  { %981 = vmatprep.subr.bf16.mxu0 %v1119_v1  ;;  %v1081_v22 = vld [vmem:[%s1391_s5] sm:$0xff]   ;;  %v1084_v61 = vld [vmem:[%s1393_s7 + $0x8] sm:$0xff]  }
   0xa   :  { %994 = vmatpush3.bf16.msra.mxu1 %v1081_v22  ;;  %v910_v24 = vld [vmem:[%s1390_s4] ss:$0 sm:$0xff] }
   0xb   :  { %995 = vmatprep.subr.bf16.mxu1 %v1119_v1  ;;  %v1083_v60 = vld [vmem:[%s1393_s7] sm:$0xff]  }
   0xc   :  { %982 = vmatpush3.bf16.msra.mxu0 %v1080_v4  ;;  %v915_v62 = vld [vmem:[%s1392_s6] ss:$0 sm:$0xff] }
   0xd   :  { %987 = vmatprep.subr.bf16.mxu0 %v1119_v1 }
   0xe   :  { %996 = vmatpush3.bf16.msra.mxu1 %v1082_v23 }
   0xf   :  { %1007 = vmatprep.subr.bf16.mxu1 %v1119_v1 }
  0xd8   :  { %v112_v6 = vpop.f32.mrb[0].mxu0 }
  0xd9   :  { %v113_v7 = vadd.f32 %v903_v5, %v112_v6  ;;  %v977_v8 = vpop.f32.mrb[1].mxu0 }
  0xda   :  { %v115_v9 = vpop.f32.mrb[2].mxu0 }
  0xdb   :  { %v119_v10 = vmul.f32 0.01, %v113_v7  ;;  %v116_v11 = vadd.f32 %v903_v5, %v115_v9  ;;  %v978_v12 = vpop.f32.mrb[3].mxu0 }
  0xdd   :  { %v120_v13 = vmul.f32 0.01, %v116_v11  ;;  %v1232_v14 = vmax.f32 %v113_v7, %v119_v10 }
  0xdf   :  { %v1234_v15 = vmax.f32 %v116_v11, %v120_v13 }
  0xe1   :  { %v123_v16 = vpack.c.bf16 %v1234_v15, %v1232_v14 }
  0xe3   :  { %984 = vmatmul.mubr.msk.bf16.vlgmr.msra.gmra.mrb[4].mxu0 %vm140_vm2, %v123_v16 }
  0xe4   :  { %989 = vmatprep.mubr.msk.bf16.mxu0 %vm1120_vm0, %v1119_v1 }
 0x1b6   :  { %v178_v17 = vpop.f32.mrb[4].mxu0 }
 0x1b7   :  { %v985_v18 = vpop.f32.mrb[5].mxu0 }
 0x1b8   :  { %v181_v19 = vpop.f32.mrb[6].mxu0 }
 0x1b9   :  { %v185_v20 = vpack.c.bf16 %v181_v19, %v178_v17  ;;  %v986_v21 = vpop.f32.mrb[7].mxu0 }
 0x1bb   :  { %988 = vmatpush3.bf16.msra.mxu0 %v185_v20 }
 0x1bc   :  { %1001 = vmatprep.subr.bf16.mxu0 %v1119_v1 }
 0x1be   :  { %990 = vmatmul.mubr.msk.bf16.vlgmr.msra.gmra.mrb[8].mxu0 %vm74_vm1, %v1209_v2 }
 0x1bf   :  { %1003 = vmatprep.mubr.msk.bf16.mxu0 %vm1120_vm0, %v1119_v1 }
 0x291   :  { %v227_v25 = vpop.f32.mrb[8].mxu0 }
 0x292   :  { %v228_v26 = vadd.f32 %v910_v24, %v227_v25  ;;  %v991_v27 = vpop.f32.mrb[9].mxu0 }
 0x293   :  { %v230_v28 = vpop.f32.mrb[10].mxu0 }
 0x294   :  { %v234_v29 = vmul.f32 0.01, %v228_v26  ;;  %v231_v30 = vadd.f32 %v910_v24, %v230_v28  ;;  %v992_v31 = vpop.f32.mrb[11].mxu0 }
 0x296   :  { %v236_v32 = vmax.f32 %v228_v26, %v234_v29  ;;  %v235_v33 = vmul.f32 0.01, %v231_v30 }
 0x298   :  { %v558_v34 = vsel %vm140_vm2, %v236_v32, -inf  ;;  %v237_v35 = vmax.f32 %v231_v30, %v235_v33 }
 0x299   :  { %v559_v36 = vrot.slane %v558_v34, 4 }
 0x29a   :  { %v238_v37 = vpack.c.bf16 %v237_v35, %v236_v32  ;;  %v565_v38 = vsel %vm140_vm2, %v237_v35, -inf }
 0x29b   :  { %v560_v39 = vmax.f32 %v558_v34, %v559_v36  ;;  %v566_v40 = vrot.slane %v565_v38, 4 }
 0x29c   :  { %998 = vmatmul.mubr.msk.bf16.vlgmr.msra.gmra.mrb[0].mxu1 %vm140_vm2, %v238_v37 }
 0x29d   :  { %v561_v41 = vrot.slane %v560_v39, 2  ;;  %v567_v42 = vmax.f32 %v565_v38, %v566_v40  ;;  %1011 = vmatprep.mubr.msk.bf16.mxu1 %vm1120_vm0, %v1119_v1  ;;  %1008 = vmatpush3.bf16.msra.mxu1 %v1083_v60 }
 0x29e   :  { %1009 = vmatprep.subr.bf16.mxu1 %v1119_v1 }
 0x29f   :  { %v562_v43 = vmax.f32 %v560_v39, %v561_v41  ;;  %v568_v44 = vrot.slane %v567_v42, 2 }
 0x2a1   :  { %v563_v45 = vrot.slane %v562_v43, 1  ;;  %v569_v46 = vmax.f32 %v567_v42, %v568_v44  ;;  %1010 = vmatpush3.bf16.msra.mxu1 %v1084_v61 }
 0x2a2   :  { %1021 = vmatprep.subr.bf16.mxu1 %v1119_v1 }
 0x2a3   :  { %v564_v47 = vmax.f32 %v562_v43, %v563_v45  ;;  %v570_v48 = vrot.slane %v569_v46, 1 }
 0x2a5   :  { %v572_v49 = vpack.c.bf16 %v564_v47, %v564_v47  ;;  %v571_v50 = vmax.f32 %v569_v46, %v570_v48 }
 0x2a7   :  { %v573_v51 = vpack.c.bf16 %v571_v50, %v571_v50  ;;  %v580_v52 = vunpack.c.l.b16 %v572_v49 }
 0x2a9   :  { %v581_v53 = vunpack.c.l.b16 %v573_v51 }
 0x2ab   :  { %v1263_v54 = vsel %vm493_vm3, %v581_v53, %v580_v52 }
 0x36f   :  { %v292_v55 = vpop.f32.mrb[0].mxu1 }
 0x370   :  { %v999_v56 = vpop.f32.mrb[1].mxu1 }
 0x371   :  { %v295_v57 = vpop.f32.mrb[2].mxu1 }
 0x372   :  { %v299_v58 = vpack.c.bf16 %v295_v57, %v292_v55  ;;  %v1000_v59 = vpop.f32.mrb[3].mxu1 }
 0x373   :  { %v1086_v59 = vld [vmem:[%s1395_s9 + $0x8] sm:$0xff]  }
 0x374   :  { %1002 = vmatpush3.bf16.msra.mxu0 %v299_v58  ;;  %v1085_v58 = vld [vmem:[%s1395_s9] sm:$0xff]  }
 0x375   :  { %1015 = vmatprep.subr.bf16.mxu0 %v1119_v1 }
 0x377   :  { %1004 = vmatmul.mubr.msk.bf16.vlgmr.msra.gmra.mrb[12].mxu0 %vm74_vm1, %v1209_v2 }
 0x378   :  { %1017 = vmatprep.mubr.msk.bf16.mxu0 %vm1120_vm0, %v1119_v1 }
 0x44a   :  { %v341_v63 = vpop.f32.mrb[12].mxu0 }
 0x44b   :  { %v342_v0 = vadd.f32 %v915_v62, %v341_v63  ;;  %v1005_v3 = vpop.f32.mrb[13].mxu0 }
 0x44c   :  { %v344_v4 = vpop.f32.mrb[14].mxu0 }
 0x44d   :  { %v348_v5 = vmul.f32 0.01, %v342_v0  ;;  %v345_v6 = vadd.f32 %v915_v62, %v344_v4  ;;  %v1006_v7 = vpop.f32.mrb[15].mxu0 }
 0x44f   :  { %v350_v8 = vmax.f32 %v342_v0, %v348_v5  ;;  %v349_v9 = vmul.f32 0.01, %v345_v6 }
 0x451   :  { %v352_v10 = vadd.f32 %v350_v8, %v1232_v14  ;;  %v640_v11 = vsel %vm140_vm2, %v350_v8, -inf  ;;  %v351_v12 = vmax.f32 %v345_v6, %v349_v9 }
 0x452   :  { %v641_v13 = vrot.slane %v640_v11, 4 }
 0x453   :  { %v722_v16 = vsel %vm140_vm2, %v352_v10, -inf  ;;  %v353_v17 = vadd.f32 %v351_v12, %v1234_v15  ;;  %v647_v18 = vsel %vm140_vm2, %v351_v12, -inf }
 0x454   :  { %v642_v19 = vmax.f32 %v640_v11, %v641_v13  ;;  %v723_v20 = vrot.slane %v722_v16, 4  ;;  %v648_v21 = vrot.slane %v647_v18, 4 }
 0x455   :  { %v354_v22 = vpack.c.bf16 %v353_v17, %v352_v10  ;;  %v729_v23 = vsel %vm140_vm2, %v353_v17, -inf }
 0x456   :  { %v643_v24 = vrot.slane %v642_v19, 2  ;;  %v724_v25 = vmax.f32 %v722_v16, %v723_v20  ;;  %v649_v26 = vmax.f32 %v647_v18, %v648_v21  ;;  %v730_v14 = vrot.slane %v729_v23, 4 }
 0x457   :  { %1012 = vmatmul.mubr.msk.bf16.vlgmr.msra.gmra.mrb[4].mxu1 %vm140_vm2, %v354_v22 }
 0x458   :  { %v644_v27 = vmax.f32 %v642_v19, %v643_v24  ;;  %v725_v28 = vrot.slane %v724_v25, 2  ;;  %v650_v29 = vrot.slane %v649_v26, 2  ;;  %v731_v30 = vmax.f32 %v729_v23, %v730_v14  ;;  %1025 = vmatprep.mubr.msk.bf16.mxu1 %vm1120_vm0, %v1119_v1  ;;  %1022 = vmatpush3.bf16.msra.mxu1 %v1085_v58 }
 0x459   :  { %1023 = vmatprep.subr.bf16.mxu1 %v1119_v1 }
 0x45a   :  { %v645_v15 = vrot.slane %v644_v27, 1  ;;  %v726_v31 = vmax.f32 %v724_v25, %v725_v28  ;;  %v651_v32 = vmax.f32 %v649_v26, %v650_v29  ;;  %v732_v33 = vrot.slane %v731_v30, 2  ;;  %v1087_v28 = vld [vmem:[%s1395_s9 + $0x10] sm:$0xff]  }
 0x45c   :  { %v646_v34 = vmax.f32 %v644_v27, %v645_v15  ;;  %v727_v35 = vrot.slane %v726_v31, 1  ;;  %v652_v36 = vrot.slane %v651_v32, 1  ;;  %v733_v37 = vmax.f32 %v731_v30, %v732_v33  ;;  %1024 = vmatpush3.bf16.msra.mxu1 %v1086_v59  ;;  %v1088_v30 = vld [vmem:[%s1395_s9 + $0x18] sm:$0xff]   ;;  %v1089_v15 = vld [vmem:[%s1395_s9 + $0x20] sm:$0xff]   ;;  %v1091_v33 = vld [vmem:[%s1395_s9 + $0x30] sm:$0xff]  }
 0x45d   :  { %1029 = vmatprep.subr.bf16.mxu1 %v1119_v1 }
 0x45e   :  { %v654_v38 = vpack.c.bf16 %v646_v34, %v646_v34  ;;  %v728_v39 = vmax.f32 %v726_v31, %v727_v35  ;;  %v653_v40 = vmax.f32 %v651_v32, %v652_v36  ;;  %v734_v41 = vrot.slane %v733_v37, 1  ;;  %v1090_v32 = vld [vmem:[%s1395_s9 + $0x28] sm:$0xff]   ;;  %v1092_v34 = vld [vmem:[%s1395_s9 + $0x38] sm:$0xff]   ;;  %v1093_v36 = vld [vmem:[%s1399_s13] sm:$0xff]  }
 0x45f   :  { %v583_v31 = vpack.c.b16 %v1263_v54, %v1263_v54 }
 0x460   :  { %v736_v42 = vpack.c.bf16 %v728_v39, %v728_v39  ;;  %v655_v43 = vpack.c.bf16 %v653_v40, %v653_v40  ;;  %v735_v44 = vmax.f32 %v733_v37, %v734_v41  ;;  %v662_v45 = vunpack.c.l.b16 %v654_v38  ;;  %v1094_v37 = vld [vmem:[%s1399_s13 + $0x8] sm:$0xff]   ;;  %v925_v38 = vld [vmem:[%s1396_s10] ss:$0 sm:$0xff] }
 0x461   :  { %v935_v40 = vld [vmem:[%s1397_s11] ss:$0 sm:$0xff]  ;;  %s895_s11 = sshll.u32 %s1121_s20, 4  ;;  %s896_s11 = int_to_ptr.vmem [resolvable:$true] %s895_s11 }
 0x462   :  { %v663_v46 = vunpack.c.l.b16 %v655_v43  ;;  %v737_v47 = vpack.c.bf16 %v735_v44, %v735_v44  ;;  %v744_v48 = vunpack.c.l.b16 %v736_v42  ;;  %p1100_p1 = scmp.lt.s32.totalorder %s896_s11, %s896_s11 }
 0x464   :  { %v745_v49 = vunpack.c.l.b16 %v737_v47  ;;  %v1291_v50 = vsel %vm493_vm3, %v663_v46, %v662_v45 }
 0x465   :  { %v665_v54 = vpack.c.b16 %v1291_v50, %v1291_v50 }
 0x466   :  { %v1294_v51 = vsel %vm493_vm3, %v745_v49, %v744_v48  ;;  %v937_v49 = vld [vmem:[%s1400_s14] ss:$0 sm:$0xff] }
 0x467   :  { %v747_v35 = vpack.c.b16 %v1294_v51, %v1294_v51 }
 0x52a   :  { %v408_v52 = vpop.f32.mrb[4].mxu1 }
 0x52b   :  { %v1013_v53 = vpop.f32.mrb[5].mxu1 }
 0x52c   :  { %v411_v55 = vpop.f32.mrb[6].mxu1 }
 0x52d   :  { %v415_v56 = vpack.c.bf16 %v411_v55, %v408_v52  ;;  %v1014_v57 = vpop.f32.mrb[7].mxu1 }
 0x52f   :  { %1016 = vmatpush3.bf16.msra.mxu0 %v415_v56 }
 0x530   :  { %1053 = vmatprep.subr.bf16.mxu0 %v1119_v1 }
 0x532   :  { %1018 = vmatmul.mubr.msk.bf16.vlgmr.msra.gmra.mrb[16].mxu0 %vm74_vm1, %v1209_v2  ;;  %v920_v2 = vld [vmem:[%s1394_s8] ss:$0 sm:$0xff] }
 0x533   :  { %1057 = vmatprep.mubr.msk.bf16.mxu0 %vm1120_vm0, %v1119_v1  ;;  %1054 = vmatpush3.bf16.msra.mxu0 %v1093_v36 }
 0x534   :  { %1055 = vmatprep.subr.bf16.mxu0 %v1119_v1 }
 0x537   :  { %1056 = vmatpush3.bf16.msra.mxu0 %v1094_v37 }
 0x605   :  { %v457_v60 = vpop.f32.mrb[16].mxu0 }
 0x606   :  { %v458_v61 = vadd.f32 %v920_v2, %v457_v60  ;;  %v1019_v62 = vpop.f32.mrb[17].mxu0 }
 0x607   :  { %v460_v63 = vpop.f32.mrb[18].mxu0 }
 0x608   :  { %v464_v0 = vmul.f32 0.01, %v458_v61  ;;  %v461_v3 = vadd.f32 %v920_v2, %v460_v63  ;;  %v1020_v4 = vpop.f32.mrb[19].mxu0 }
 0x60a   :  { %v466_v5 = vmax.f32 %v458_v61, %v464_v0  ;;  %v465_v6 = vmul.f32 0.01, %v461_v3 }
 0x60c   :  { %v469_v7 = vsel %vm140_vm2, %v466_v5, -inf  ;;  %v467_v8 = vmax.f32 %v461_v3, %v465_v6 }
 0x60d   :  { %v470_v9 = vrot.slane %v469_v7, 4 }
 0x60e   :  { %v476_v10 = vsel %vm140_vm2, %v467_v8, -inf }
 0x60f   :  { %v471_v11 = vmax.f32 %v469_v7, %v470_v9  ;;  %v477_v12 = vrot.slane %v476_v10, 4 }
 0x611   :  { %v472_v13 = vrot.slane %v471_v11, 2  ;;  %v478_v16 = vmax.f32 %v476_v10, %v477_v12 }
 0x613   :  { %v473_v17 = vmax.f32 %v471_v11, %v472_v13  ;;  %v479_v18 = vrot.slane %v478_v16, 2 }
 0x615   :  { %v474_v19 = vrot.slane %v473_v17, 1  ;;  %v480_v20 = vmax.f32 %v478_v16, %v479_v18 }
 0x617   :  { %v475_v21 = vmax.f32 %v473_v17, %v474_v19  ;;  %v481_v22 = vrot.slane %v480_v20, 1 }
 0x619   :  { %v483_v23 = vpack.c.bf16 %v475_v21, %v475_v21  ;;  %v482_v24 = vmax.f32 %v480_v20, %v481_v22 }
 0x61b   :  { %v484_v25 = vpack.c.bf16 %v482_v24, %v482_v24  ;;  %v491_v26 = vunpack.c.l.b16 %v483_v23 }
 0x61d   :  { %v492_v14 = vunpack.c.l.b16 %v484_v25 }
 0x61f   :  { %v494_v27 = vsel %vm493_vm3, %v492_v14, %v491_v26 }
 0x620   :  { %v495_v29 = vpack.c.b16 %v494_v27, %v494_v27 }
 0x622   :  { %1026 = vmatmul.mubr.msk.bf16.vlgmr.msra.gmra.mrb[8].mxu1 %vm140_vm2, %v495_v29 }
 0x623   :  { %1030 = vmatpush3.bf16.msra.mxu1 %v1087_v28  ;;  %1033 = vmatprep.mubr.msk.bf16.mxu1 %vm1120_vm0, %v1119_v1 }
 0x624   :  { %1031 = vmatprep.subr.bf16.mxu1 %v1119_v1 }
 0x627   :  { %1032 = vmatpush3.bf16.msra.mxu1 %v1088_v30 }
 0x628   :  { %1037 = vmatprep.subr.bf16.mxu1 %v1119_v1 }
 0x62e   :  { %1034 = vmatmul.mubr.msk.bf16.vlgmr.msra.gmra.mrb[8].mxu1 %vm140_vm2, %v583_v31 }
 0x62f   :  { %1038 = vmatpush3.bf16.msra.mxu1 %v1089_v15  ;;  %1041 = vmatprep.mubr.msk.bf16.mxu1 %vm1120_vm0, %v1119_v1 }
 0x630   :  { %1039 = vmatprep.subr.bf16.mxu1 %v1119_v1 }
 0x633   :  { %1040 = vmatpush3.bf16.msra.mxu1 %v1090_v32 }
 0x634   :  { %1045 = vmatprep.subr.bf16.mxu1 %v1119_v1 }
 0x63a   :  { %1042 = vmatmul.mubr.msk.bf16.vlgmr.msra.gmra.mrb[8].mxu1 %vm140_vm2, %v665_v54 }
 0x63b   :  { %1046 = vmatpush3.bf16.msra.mxu1 %v1091_v33  ;;  %1049 = vmatprep.mubr.msk.bf16.mxu1 %vm1120_vm0, %v1119_v1 }
 0x63c   :  { %1047 = vmatprep.subr.bf16.mxu1 %v1119_v1  ;;  %v936_v1 = vld [vmem:[%s1398_s12] ss:$0 sm:$0xff]  ;;  %s1095_s12 = scalar_lea.vmem %s896_s11, 32 }
 0x63d   :  { %p1096_p0 = scmp.ne.s32.totalorder %s896_s11, %s1095_s12  ;;  %p1101_p2 = scmp.lt.s32.totalorder %s1095_s12, %s1095_s12 }
 0x63f   :  { %1048 = vmatpush3.bf16.msra.mxu1 %v1092_v34  ;;  %p1102_p3 = por %p1101_p2, %p1100_p1 }
 0x641   :  { %p1103_p4 = pnand %p1102_p3, %p1096_p0 }
 0x646   :  { %1050 = vmatmul.mubr.msk.bf16.vlgmr.msra.gmra.mrb[8].mxu1 %vm140_vm2, %v747_v35 }
 0x719   :  { %v797_v39 = vpop.f32.mrb[8].mxu1 }
 0x71a   :  { %v1061_v41 = vadd.f32 %v925_v38, %v797_v39  ;;  %v1051_v42 = vpop.f32.mrb[9].mxu1 }
 0x71b   :  { %v800_v43 = vpop.f32.mrb[10].mxu1 }
 0x71c   :  { %v811_v44 = vmul.f32 %v1061_v41, %v935_v40  ;;  %v1052_v45 = vpop.f32.mrb[11].mxu1 }
 0x71e   :  { %v819_v46 = vadd.f32 %v936_v1, %v811_v44 }
 0x720   :  { %v820_v47 = vmax.f32 %v819_v46, 0.0 }
 0x722   :  { %v821_v48 = vpack.c.bf16 %v820_v47, %v820_v47 }
 0x724   :  { %1058 = vmatmul.mubr.msk.bf16.vlgmr.msra.gmra.mrb[20].mxu0 %vm140_vm2, %v821_v48 }
 0x7f7   :  { %v882_v50 = vpop.f32.mrb[20].mxu0 }
 0x7f8   :  { %v883_v51 = vadd.f32 %v937_v49, %v882_v50  ;;  %v1059_v52 = vpop.f32.mrb[21].mxu0 }
 0x7f9   :  { %v885_v53 = vpop.f32.mrb[22].mxu0 }
 0x7fa   :  { %888 = vst [vmem:[#allocation2] sm:$0x3] %v883_v51  ;;  %v1060_v55 = vpop.f32.mrb[23].mxu0 }
 0x7fb   :  { %1106 = shalt.err (!%p1103_p4)
}
 0x7fc   :  { %s1107_s14 = scalar_lea.hbm %s1401_s15, 32 }
 0x7fd   :  { %p1108_p5 = scmp.ne.s32.totalorder %s1401_s15, %s1107_s14  ;;  %p1111_p6 = scmp.lt.u32.totalorder %s1107_s14, %s1401_s15 }
 0x7ff   :  { %p1113_p7 = pnand %p1111_p6, %p1108_p5 }
 0x801   :  { %1116 = shalt.err (!%p1113_p7)
}
 0x802   :  { %898 = dma.vmem_to_hbm [thread:$0]  %s896_s11, 32, %s1401_s15, [#allocation3]  }
 0x803   :  { %1117 = dma.done.wait [#allocation3], 32  }
 0x804   :  { %1118 = vsyncadd [#allocation3], 4294967264 }
 0x805   :  { %902 = vsyncpa [#allocation3], 1 }

</bundles_post_ra>
